<compile_context>
chip_gen: v6e
topology: v6e:2x2x1
jax: 0.10.0
libtpu: 0.0.40
codegen_flags: <defaults>
</compile_context>

<pallas_src>
from functools import partial

import jax
import jax.numpy as jnp
from jax import lax
from jax.experimental import pallas as pl
from jax.experimental.pallas import tpu as pltpu


def _gru_gates(cur, h, w_ih_t, w_hh_t, b_i, b_hn):
    """One GRU cell step.

    cur    : [B, max_in] f32   running layer input (stale lanes hit zero rows)
    h      : [B, H]      f32   previous hidden state of this layer
    w_ih_t : [max_in, 3H]      pre-transposed input weights (r|z|n columns)
    w_hh_t : [H, 3H]           pre-transposed hidden weights (r|z|n columns)
    b_i    : [1, 3H]     f32   (b_ir+b_hr | b_iz+b_hz | b_in)
    b_hn   : [1, H]      f32   b_hn (kept separate: it sits inside r*(...))
    returns h_new : [B, H] f32
    """
    H = h.shape[-1]
    wdt = w_ih_t.dtype
    # Two zero-free MXU pushes; f32 accumulation; gate math stays f32.
    gi = jnp.dot(cur.astype(wdt), w_ih_t, preferred_element_type=jnp.float32) + b_i
    gh = jnp.dot(h.astype(wdt), w_hh_t, preferred_element_type=jnp.float32)
    r = jax.nn.sigmoid(gi[:, 0:H] + gh[:, 0:H])
    z = jax.nn.sigmoid(gi[:, H:2 * H] + gh[:, H:2 * H])
    n = jnp.tanh(gi[:, 2 * H:3 * H] + r * (gh[:, 2 * H:3 * H] + b_hn))
    return (1.0 - z) * n + z * h


def _fused_mlgru_kernel(x_ref, h_ref, w_ih_ref, w_hh_ref, b_i_ref, b_hn_ref,
                        out_ref, cur_ref):
    """Whole layer stack in a single kernel invocation (no grid).

    x_ref    : [B, max_in]        layer-0 input, zero-padded to max_in (f32)
    h_ref    : [L, B, H]          previous hidden states, all layers (f32)
    w_ih_ref : [L, max_in, 3H]    pre-transposed input weights
    w_hh_ref : [L, H, 3H]         pre-transposed hidden weights
    b_i_ref  : [L, 1, 3H]         fused bias (b_ir+b_hr | b_iz+b_hz | b_in)
    b_hn_ref : [L, 1, H]          b_hn
    out_ref  : [L, B, H]          new hidden states (single slab writeback)
    cur_ref  : [B, max_in]        VMEM scratch carrying the running layer input
    """
    L, _, H = out_ref.shape
    cur_ref[...] = x_ref[...]

    def layer_step(l, carry):
        h = h_ref[l]
        h_new = _gru_gates(cur_ref[...], h, w_ih_ref[l], w_hh_ref[l],
                           b_i_ref[l], b_hn_ref[l])
        out_ref[l] = h_new.astype(out_ref.dtype)
        # Sliced store; stale lanes H:max_in (if any) hit zero weight rows.
        cur_ref[:, :H] = h_new
        return carry

    lax.fori_loop(0, L, layer_step, None, unroll=True)


def _streamed_mlgru_kernel(x_ref, h_ref, w_ih_ref, w_hh_ref, b_i_ref, b_hn_ref,
                           out_ref, cur_ref):
    """One grid step == one GRU layer; weights streamed (double-buffered).

    Used only when the full weight stack would not fit comfortably in VMEM.
    TODO(synk): for very large H on v7x (64 MiB VMEM), additionally tile the
                3H gate-column axis of the weight BlockSpecs and set
                vmem_limit_bytes explicitly with headroom.
    """
    H = out_ref.shape[-1]

    @pl.when(pl.program_id(0) == 0)
    def _():
        cur_ref[...] = x_ref[...]

    h = h_ref[...]
    h_new = _gru_gates(cur_ref[...], h, w_ih_ref[...], w_hh_ref[...],
                       b_i_ref[...], b_hn_ref[...])
    out_ref[...] = h_new.astype(out_ref.dtype)
    cur_ref[:, :H] = h_new


def prepare_params(params, input_size, hidden_size, weights_dtype=jnp.bfloat16):
    """One-time parameter preparation (hoisted out of the per-step forward).

    Builds zero-free, pre-transposed per-layer weight stacks
        w_ih_t : [L, max_in, 3H]   (layer-0 rows input_size:max_in are zero;
                                    for layers >= 1, rows H:max_in are zero)
        w_hh_t : [L, H, 3H]
    column order r | z | n, plus biases
        b_i  : [L, 1, 3H] = [b_ir+b_hr | b_iz+b_hz | b_in]   (f32)
        b_hn : [L, 1, H]                                      (f32)

    weights_dtype defaults to bfloat16 on all TPU generations (MXU-native);
    gate elementwise math stays in f32 inside the kernel.
    """
    H = hidden_size
    max_in = max(input_size, H)
    w_ih_l, w_hh_l, b_i_l, b_hn_l = [], [], [], []
    for i, p in enumerate(params):
        in_sz = input_size if i == 0 else H
        w_ih = jnp.asarray(p["w_ih"], jnp.float32)   # [3H, in_sz] (PyTorch layout)
        w_hh = jnp.asarray(p["w_hh"], jnp.float32)   # [3H, H]
        b_ih = jnp.asarray(p["b_ih"], jnp.float32)   # [3H]
        b_hh = jnp.asarray(p["b_hh"], jnp.float32)   # [3H]

        wi = jnp.zeros((max_in, 3 * H), jnp.float32)
        wi = wi.at[:in_sz, :].set(w_ih.T)            # rows in_sz:max_in stay zero
        wh = w_hh.T                                   # [H, 3H]

        b_i = jnp.concatenate([
            b_ih[0:H] + b_hh[0:H],                    # r bias
            b_ih[H:2 * H] + b_hh[H:2 * H],            # z bias
            b_ih[2 * H:3 * H],                        # i_n bias
        ]).reshape(1, 3 * H)
        b_hn = b_hh[2 * H:3 * H].reshape(1, H)

        w_ih_l.append(wi)
        w_hh_l.append(wh)
        b_i_l.append(b_i)
        b_hn_l.append(b_hn)

    w_ih_t = jnp.stack(w_ih_l, axis=0).astype(weights_dtype)   # [L, max_in, 3H]
    w_hh_t = jnp.stack(w_hh_l, axis=0).astype(weights_dtype)   # [L, H, 3H]
    b_i = jnp.stack(b_i_l, axis=0)                              # [L, 1, 3H] f32
    b_hn = jnp.stack(b_hn_l, axis=0)                            # [L, 1, H]  f32
    return w_ih_t, w_hh_t, b_i, b_hn


# Resident-path budget: keep well under the 32 MiB default scoped VMEM
# (v6e/v7x) so there is headroom for layouts/padding.
_RESIDENT_VMEM_BUDGET_BYTES = 16 * (1 << 20)


@partial(jax.jit, static_argnames=("force_streamed",))
def multi_layer_gru_cell_forward(x, h, w_ih_t, w_hh_t, b_i, b_hn, *,
                                 force_streamed=False):
    """Equivalent of MultiLayerGRUCell.forward (eval mode).

    Args:
      x:      [B, input_size] float32
      h:      [num_layers, B, H] float32
      w_ih_t, w_hh_t, b_i, b_hn: outputs of prepare_params()
    Returns:
      outputs: [num_layers, B, H] float32
    """
    L, B, H = h.shape
    max_in = w_ih_t.shape[1]
    in_sz = x.shape[1]

    x = x.astype(jnp.float32)
    if in_sz < max_in:
        # Zero-pad; the pad lanes hit zero weight rows of layer 0.
        x = jnp.pad(x, ((0, 0), (0, max_in - in_sz)))
    h = h.astype(jnp.float32)

    def nbytes(a):
        return a.size * a.dtype.itemsize

    resident_bytes = (nbytes(w_ih_t) + nbytes(w_hh_t) + nbytes(b_i)
                      + nbytes(b_hn) + nbytes(h) + nbytes(x)
                      + L * B * H * 4          # output
                      + B * max_in * 4)        # scratch
    use_fused = (not force_streamed) and resident_bytes <= _RESIDENT_VMEM_BUDGET_BYTES

    if use_fused:
        # Single kernel invocation: no grid, everything VMEM-resident, one
        # output slab DMA, layer loop unrolled inside the kernel.
        return pl.pallas_call(
            _fused_mlgru_kernel,
            out_shape=jax.ShapeDtypeStruct((L, B, H), jnp.float32),
            scratch_shapes=[pltpu.VMEM((B, max_in), jnp.float32)],
        )(x, h, w_ih_t, w_hh_t, b_i, b_hn)

    # Streamed per-layer path: weights/bias/h/out blocks DMA'd layer-by-layer
    # (auto double-buffered); the running layer input stays in VMEM scratch.
    grid_spec = pltpu.PrefetchScalarGridSpec(
        num_scalar_prefetch=0,
        grid=(L,),
        in_specs=[
            pl.BlockSpec((B, max_in), lambda l: (0, 0)),              # x (resident)
            pl.BlockSpec((None, B, H), lambda l: (l, 0, 0)),          # h[l]
            pl.BlockSpec((None, max_in, 3 * H), lambda l: (l, 0, 0)), # W_ih^T[l]
            pl.BlockSpec((None, H, 3 * H), lambda l: (l, 0, 0)),      # W_hh^T[l]
            pl.BlockSpec((None, 1, 3 * H), lambda l: (l, 0, 0)),      # b_i[l]
            pl.BlockSpec((None, 1, H), lambda l: (l, 0, 0)),          # b_hn[l]
        ],
        out_specs=pl.BlockSpec((None, B, H), lambda l: (l, 0, 0)),
        scratch_shapes=[pltpu.VMEM((B, max_in), jnp.float32)],
    )
    return pl.pallas_call(
        _streamed_mlgru_kernel,
        out_shape=jax.ShapeDtypeStruct((L, B, H), jnp.float32),
        grid_spec=grid_spec,
        compiler_params=pltpu.CompilerParams(
            # Layers are sequentially dependent (scratch carries the input).
            dimension_semantics=("arbitrary",),
        ),
    )(x, h, w_ih_t, w_hh_t, b_i, b_hn)


def init_params(key, input_size, hidden_size, num_layers):
    """Deterministic parameter init mimicking nn.GRUCell shapes (PyTorch layout)."""
    params = []
    for i in range(num_layers):
        in_sz = input_size if i == 0 else hidden_size
        key, k1, k2, k3, k4 = jax.random.split(key, 5)
        scale = 1.0 / jnp.sqrt(hidden_size)
        params.append({
            "w_ih": jax.random.uniform(k1, (3 * hidden_size, in_sz),
                                       jnp.float32, -scale, scale),
            "w_hh": jax.random.uniform(k2, (3 * hidden_size, hidden_size),
                                       jnp.float32, -scale, scale),
            "b_ih": jax.random.uniform(k3, (3 * hidden_size,),
                                       jnp.float32, -scale, scale),
            "b_hh": jax.random.uniform(k4, (3 * hidden_size,),
                                       jnp.float32, -scale, scale),
        })
    return params


def _reference_forward(x, h, params, num_layers):
    """Pure-JAX reference of the same math (correctness sanity check)."""
    outs = []
    cur = x
    for i in range(num_layers):
        p = params[i]
        gi = cur @ p["w_ih"].T + p["b_ih"]
        gh = h[i] @ p["w_hh"].T + p["b_hh"]
        H = h.shape[-1]
        r = jax.nn.sigmoid(gi[:, :H] + gh[:, :H])
        z = jax.nn.sigmoid(gi[:, H:2 * H] + gh[:, H:2 * H])
        n = jnp.tanh(gi[:, 2 * H:] + r * gh[:, 2 * H:])
        cur = (1.0 - z) * n + z * h[i]
        outs.append(cur)
    return jnp.stack(outs, axis=0)


if __name__ == "__main__":
    batch_size = 2
    input_size = 16
    hidden_size = 32
    num_layers = 3

    key = jax.random.PRNGKey(0)
    key, kx, kh, kp = jax.random.split(key, 4)

    x = jax.random.normal(kx, (batch_size, input_size), jnp.float32)
    h = jax.random.normal(kh, (num_layers, batch_size, hidden_size), jnp.float32)
    params = init_params(kp, input_size, hidden_size, num_layers)
    ref = _reference_forward(x, h, params, num_layers)

    # --- f32 weights, fused (fully VMEM-resident, single grid step) path ----
    pf32 = prepare_params(params, input_size, hidden_size,
                          weights_dtype=jnp.float32)
    out = jax.block_until_ready(multi_layer_gru_cell_forward(x, h, *pf32))
    assert out.shape == (num_layers, batch_size, hidden_size), out.shape
    assert jnp.allclose(out, ref, atol=1e-4, rtol=1e-4), \
        float(jnp.max(jnp.abs(out - ref)))

    # --- streamed per-layer grid path (forced; auto-selected only when the
    #     weight stack would not fit comfortably in VMEM) ---------------------
    out_s = jax.block_until_ready(
        multi_layer_gru_cell_forward(x, h, *pf32, force_streamed=True))
    assert jnp.allclose(out_s, ref, atol=1e-4, rtol=1e-4), \
        float(jnp.max(jnp.abs(out_s - ref)))

    # --- bf16 weights (default prepare_params dtype on all TPU generations):
    #     halves weight DMA/VMEM bytes; matmul inputs are bf16 so tolerance is
    #     looser (gate elementwise math and biases stay f32) ------------------
    pbf16 = prepare_params(params, input_size, hidden_size)
    out_bf = jax.block_until_ready(multi_layer_gru_cell_forward(x, h, *pbf16))
    assert jnp.allclose(out_bf, ref, atol=5e-2, rtol=0.0), \
        float(jnp.max(jnp.abs(out_bf - ref)))

    # NOTE: the biggest remaining utilization lever is caller-side batching --
    # at B=2 the MXU rows are ~1% occupied; if independent GRU-cell
    # invocations exist, merge them into one call (cost is ~flat up to B~128+).

    print("KERNEL_OK")
</pallas_src>

<mosaic_0001>
module attributes {stable_mosaic.version = 11 : i64} {
  func.func @_fused_mlgru_kernel(%arg0: memref<2x32xf32, #tpu.memory_space<vmem>>, %arg1: memref<3x2x32xf32, #tpu.memory_space<vmem>>, %arg2: memref<3x32x96xf32, #tpu.memory_space<vmem>>, %arg3: memref<3x32x96xf32, #tpu.memory_space<vmem>>, %arg4: memref<3x1x96xf32, #tpu.memory_space<vmem>>, %arg5: memref<3x1x32xf32, #tpu.memory_space<vmem>>, %arg6: memref<3x2x32xf32, #tpu.memory_space<vmem>>, %arg7: memref<2x32xf32, #tpu.memory_space<vmem>>) attributes {dimension_semantics = [], scalar_prefetch = 0 : i64, scratch_operands = 1 : i64, tpu.core_type = #tpu.core_type<tc>} {
    %c0 = arith.constant 0 : index
    %c0_0 = arith.constant 0 : index
    %0 = vector.load %arg0[%c0, %c0_0] : memref<2x32xf32, #tpu.memory_space<vmem>>, vector<2x32xf32>
    %c0_1 = arith.constant 0 : index
    %c0_2 = arith.constant 0 : index
    %1 = vector.load %arg7[%c0_1, %c0_2] : memref<2x32xf32, #tpu.memory_space<vmem>>, vector<2x32xf32>
    tpu.vector_store %arg7[%c0_1, %c0_2], %0 {strides = array<i32>} : memref<2x32xf32, #tpu.memory_space<vmem>>, vector<2x32xf32>,
    %c0_i32 = arith.constant 0 : i32
    %2 = arith.index_cast %c0_i32 : i32 to index
    %c0_3 = arith.constant 0 : index
    %c0_4 = arith.constant 0 : index
    %3 = vector.load %arg1[%2, %c0_3, %c0_4] : memref<3x2x32xf32, #tpu.memory_space<vmem>>, vector<1x2x32xf32>
    %4 = vector.shape_cast %3 : vector<1x2x32xf32> to vector<2x32xf32>
    %c0_5 = arith.constant 0 : index
    %c0_6 = arith.constant 0 : index
    %5 = vector.load %arg7[%c0_5, %c0_6] : memref<2x32xf32, #tpu.memory_space<vmem>>, vector<2x32xf32>
    %6 = arith.index_cast %c0_i32 : i32 to index
    %c0_7 = arith.constant 0 : index
    %c0_8 = arith.constant 0 : index
    %7 = vector.load %arg2[%6, %c0_7, %c0_8] : memref<3x32x96xf32, #tpu.memory_space<vmem>>, vector<1x32x96xf32>
    %8 = vector.shape_cast %7 : vector<1x32x96xf32> to vector<32x96xf32>
    %9 = arith.index_cast %c0_i32 : i32 to index
    %c0_9 = arith.constant 0 : index
    %c0_10 = arith.constant 0 : index
    %10 = vector.load %arg3[%9, %c0_9, %c0_10] : memref<3x32x96xf32, #tpu.memory_space<vmem>>, vector<1x32x96xf32>
    %11 = vector.shape_cast %10 : vector<1x32x96xf32> to vector<32x96xf32>
    %12 = arith.index_cast %c0_i32 : i32 to index
    %c0_11 = arith.constant 0 : index
    %c0_12 = arith.constant 0 : index
    %13 = vector.load %arg4[%12, %c0_11, %c0_12] : memref<3x1x96xf32, #tpu.memory_space<vmem>>, vector<1x1x96xf32>
    %14 = vector.shape_cast %13 : vector<1x1x96xf32> to vector<1x96xf32>
    %15 = arith.index_cast %c0_i32 : i32 to index
    %c0_13 = arith.constant 0 : index
    %c0_14 = arith.constant 0 : index
    %16 = vector.load %arg5[%15, %c0_13, %c0_14] : memref<3x1x32xf32, #tpu.memory_space<vmem>>, vector<1x1x32xf32>
    %17 = vector.shape_cast %16 : vector<1x1x32xf32> to vector<1x32xf32>
    %cst = arith.constant dense<0.000000e+00> : vector<2x96xf32>
    %18 = tpu.matmul %5, %8, %cst {dimension_numbers = #tpu.dot_dimension_numbers<[1], [0], [0], [1], [0, 0, 1, 1], [], []>} : vector<2x32xf32>, vector<32x96xf32>, vector<2x96xf32> -> vector<2x96xf32>
    %19 = vector.broadcast %14 : vector<1x96xf32> to vector<2x96xf32>
    %20 = arith.addf %18, %19 : vector<2x96xf32>
    %cst_15 = arith.constant dense<0.000000e+00> : vector<2x96xf32>
    %21 = tpu.matmul %4, %11, %cst_15 {dimension_numbers = #tpu.dot_dimension_numbers<[1], [0], [0], [1], [0, 0, 1, 1], [], []>} : vector<2x32xf32>, vector<32x96xf32>, vector<2x96xf32> -> vector<2x96xf32>
    %22 = vector.extract_strided_slice %20 {offsets = [0, 0], sizes = [2, 32], strides = [1, 1]} : vector<2x96xf32> to vector<2x32xf32>
    %23 = vector.extract_strided_slice %21 {offsets = [0, 0], sizes = [2, 32], strides = [1, 1]} : vector<2x96xf32> to vector<2x32xf32>
    %24 = arith.addf %22, %23 : vector<2x32xf32>
    %25 = arith.negf %24 : vector<2x32xf32>
    %26 = math.exp %25 : vector<2x32xf32>
    %cst_16 = arith.constant 1.000000e+00 : f32
    %27 = vector.broadcast %cst_16 : f32 to vector<2x32xf32>
    %28 = arith.addf %27, %26 : vector<2x32xf32>
    %29 = arith.divf %27, %28 : vector<2x32xf32>
    %30 = vector.extract_strided_slice %20 {offsets = [0, 32], sizes = [2, 32], strides = [1, 1]} : vector<2x96xf32> to vector<2x32xf32>
    %31 = vector.extract_strided_slice %21 {offsets = [0, 32], sizes = [2, 32], strides = [1, 1]} : vector<2x96xf32> to vector<2x32xf32>
    %32 = arith.addf %30, %31 : vector<2x32xf32>
    %33 = arith.negf %32 : vector<2x32xf32>
    %34 = math.exp %33 : vector<2x32xf32>
    %cst_17 = arith.constant 1.000000e+00 : f32
    %35 = vector.broadcast %cst_17 : f32 to vector<2x32xf32>
    %36 = arith.addf %35, %34 : vector<2x32xf32>
    %37 = arith.divf %35, %36 : vector<2x32xf32>
    %38 = vector.extract_strided_slice %20 {offsets = [0, 64], sizes = [2, 32], strides = [1, 1]} : vector<2x96xf32> to vector<2x32xf32>
    %39 = vector.extract_strided_slice %21 {offsets = [0, 64], sizes = [2, 32], strides = [1, 1]} : vector<2x96xf32> to vector<2x32xf32>
    %40 = vector.broadcast %17 : vector<1x32xf32> to vector<2x32xf32>
    %41 = arith.addf %39, %40 : vector<2x32xf32>
    %42 = arith.mulf %29, %41 : vector<2x32xf32>
    %43 = arith.addf %38, %42 : vector<2x32xf32>
    %44 = math.tanh %43 : vector<2x32xf32>
    %cst_18 = arith.constant 1.000000e+00 : f32
    %45 = vector.broadcast %cst_18 : f32 to vector<2x32xf32>
    %46 = arith.subf %45, %37 : vector<2x32xf32>
    %47 = arith.mulf %46, %44 : vector<2x32xf32>
    %48 = arith.mulf %37, %4 : vector<2x32xf32>
    %49 = arith.addf %47, %48 : vector<2x32xf32>
    %50 = arith.index_cast %c0_i32 : i32 to index
    %c0_19 = arith.constant 0 : index
    %c0_20 = arith.constant 0 : index
    %51 = vector.load %arg6[%50, %c0_19, %c0_20] : memref<3x2x32xf32, #tpu.memory_space<vmem>>, vector<1x2x32xf32>
    %52 = vector.shape_cast %51 : vector<1x2x32xf32> to vector<2x32xf32>
    %53 = vector.shape_cast %49 : vector<2x32xf32> to vector<1x2x32xf32>
    tpu.vector_store %arg6[%50, %c0_19, %c0_20], %53 {strides = array<i32>} : memref<3x2x32xf32, #tpu.memory_space<vmem>>, vector<1x2x32xf32>,
    %c0_21 = arith.constant 0 : index
    %c0_22 = arith.constant 0 : index
    %54 = vector.load %arg7[%c0_21, %c0_22] : memref<2x32xf32, #tpu.memory_space<vmem>>, vector<2x32xf32>
    tpu.vector_store %arg7[%c0_21, %c0_22], %49 {strides = array<i32>} : memref<2x32xf32, #tpu.memory_space<vmem>>, vector<2x32xf32>,
    %c1_i32 = arith.constant 1 : i32
    %55 = arith.index_cast %c1_i32 : i32 to index
    %c0_23 = arith.constant 0 : index
    %c0_24 = arith.constant 0 : index
    %56 = vector.load %arg1[%55, %c0_23, %c0_24] : memref<3x2x32xf32, #tpu.memory_space<vmem>>, vector<1x2x32xf32>
    %57 = vector.shape_cast %56 : vector<1x2x32xf32> to vector<2x32xf32>
    %c0_25 = arith.constant 0 : index
    %c0_26 = arith.constant 0 : index
    %58 = vector.load %arg7[%c0_25, %c0_26] : memref<2x32xf32, #tpu.memory_space<vmem>>, vector<2x32xf32>
    %59 = arith.index_cast %c1_i32 : i32 to index
    %c0_27 = arith.constant 0 : index
    %c0_28 = arith.constant 0 : index
    %60 = vector.load %arg2[%59, %c0_27, %c0_28] : memref<3x32x96xf32, #tpu.memory_space<vmem>>, vector<1x32x96xf32>
    %61 = vector.shape_cast %60 : vector<1x32x96xf32> to vector<32x96xf32>
    %62 = arith.index_cast %c1_i32 : i32 to index
    %c0_29 = arith.constant 0 : index
    %c0_30 = arith.constant 0 : index
    %63 = vector.load %arg3[%62, %c0_29, %c0_30] : memref<3x32x96xf32, #tpu.memory_space<vmem>>, vector<1x32x96xf32>
    %64 = vector.shape_cast %63 : vector<1x32x96xf32> to vector<32x96xf32>
    %65 = arith.index_cast %c1_i32 : i32 to index
    %c0_31 = arith.constant 0 : index
    %c0_32 = arith.constant 0 : index
    %66 = vector.load %arg4[%65, %c0_31, %c0_32] : memref<3x1x96xf32, #tpu.memory_space<vmem>>, vector<1x1x96xf32>
    %67 = vector.shape_cast %66 : vector<1x1x96xf32> to vector<1x96xf32>
    %68 = arith.index_cast %c1_i32 : i32 to index
    %c0_33 = arith.constant 0 : index
    %c0_34 = arith.constant 0 : index
    %69 = vector.load %arg5[%68, %c0_33, %c0_34] : memref<3x1x32xf32, #tpu.memory_space<vmem>>, vector<1x1x32xf32>
    %70 = vector.shape_cast %69 : vector<1x1x32xf32> to vector<1x32xf32>
    %cst_35 = arith.constant dense<0.000000e+00> : vector<2x96xf32>
    %71 = tpu.matmul %58, %61, %cst_35 {dimension_numbers = #tpu.dot_dimension_numbers<[1], [0], [0], [1], [0, 0, 1, 1], [], []>} : vector<2x32xf32>, vector<32x96xf32>, vector<2x96xf32> -> vector<2x96xf32>
    %72 = vector.broadcast %67 : vector<1x96xf32> to vector<2x96xf32>
    %73 = arith.addf %71, %72 : vector<2x96xf32>
    %cst_36 = arith.constant dense<0.000000e+00> : vector<2x96xf32>
    %74 = tpu.matmul %57, %64, %cst_36 {dimension_numbers = #tpu.dot_dimension_numbers<[1], [0], [0], [1], [0, 0, 1, 1], [], []>} : vector<2x32xf32>, vector<32x96xf32>, vector<2x96xf32> -> vector<2x96xf32>
    %75 = vector.extract_strided_slice %73 {offsets = [0, 0], sizes = [2, 32], strides = [1, 1]} : vector<2x96xf32> to vector<2x32xf32>
    %76 = vector.extract_strided_slice %74 {offsets = [0, 0], sizes = [2, 32], strides = [1, 1]} : vector<2x96xf32> to vector<2x32xf32>
    %77 = arith.addf %75, %76 : vector<2x32xf32>
    %78 = arith.negf %77 : vector<2x32xf32>
    %79 = math.exp %78 : vector<2x32xf32>
    %cst_37 = arith.constant 1.000000e+00 : f32
    %80 = vector.broadcast %cst_37 : f32 to vector<2x32xf32>
    %81 = arith.addf %80, %79 : vector<2x32xf32>
    %82 = arith.divf %80, %81 : vector<2x32xf32>
    %83 = vector.extract_strided_slice %73 {offsets = [0, 32], sizes = [2, 32], strides = [1, 1]} : vector<2x96xf32> to vector<2x32xf32>
    %84 = vector.extract_strided_slice %74 {offsets = [0, 32], sizes = [2, 32], strides = [1, 1]} : vector<2x96xf32> to vector<2x32xf32>
    %85 = arith.addf %83, %84 : vector<2x32xf32>
    %86 = arith.negf %85 : vector<2x32xf32>
    %87 = math.exp %86 : vector<2x32xf32>
    %cst_38 = arith.constant 1.000000e+00 : f32
    %88 = vector.broadcast %cst_38 : f32 to vector<2x32xf32>
    %89 = arith.addf %88, %87 : vector<2x32xf32>
    %90 = arith.divf %88, %89 : vector<2x32xf32>
    %91 = vector.extract_strided_slice %73 {offsets = [0, 64], sizes = [2, 32], strides = [1, 1]} : vector<2x96xf32> to vector<2x32xf32>
    %92 = vector.extract_strided_slice %74 {offsets = [0, 64], sizes = [2, 32], strides = [1, 1]} : vector<2x96xf32> to vector<2x32xf32>
    %93 = vector.broadcast %70 : vector<1x32xf32> to vector<2x32xf32>
    %94 = arith.addf %92, %93 : vector<2x32xf32>
    %95 = arith.mulf %82, %94 : vector<2x32xf32>
    %96 = arith.addf %91, %95 : vector<2x32xf32>
    %97 = math.tanh %96 : vector<2x32xf32>
    %cst_39 = arith.constant 1.000000e+00 : f32
    %98 = vector.broadcast %cst_39 : f32 to vector<2x32xf32>
    %99 = arith.subf %98, %90 : vector<2x32xf32>
    %100 = arith.mulf %99, %97 : vector<2x32xf32>
    %101 = arith.mulf %90, %57 : vector<2x32xf32>
    %102 = arith.addf %100, %101 : vector<2x32xf32>
    %103 = arith.index_cast %c1_i32 : i32 to index
    %c0_40 = arith.constant 0 : index
    %c0_41 = arith.constant 0 : index
    %104 = vector.load %arg6[%103, %c0_40, %c0_41] : memref<3x2x32xf32, #tpu.memory_space<vmem>>, vector<1x2x32xf32>
    %105 = vector.shape_cast %104 : vector<1x2x32xf32> to vector<2x32xf32>
    %106 = vector.shape_cast %102 : vector<2x32xf32> to vector<1x2x32xf32>
    tpu.vector_store %arg6[%103, %c0_40, %c0_41], %106 {strides = array<i32>} : memref<3x2x32xf32, #tpu.memory_space<vmem>>, vector<1x2x32xf32>,
    %c0_42 = arith.constant 0 : index
    %c0_43 = arith.constant 0 : index
    %107 = vector.load %arg7[%c0_42, %c0_43] : memref<2x32xf32, #tpu.memory_space<vmem>>, vector<2x32xf32>
    tpu.vector_store %arg7[%c0_42, %c0_43], %102 {strides = array<i32>} : memref<2x32xf32, #tpu.memory_space<vmem>>, vector<2x32xf32>,
    %c2_i32 = arith.constant 2 : i32
    %108 = arith.index_cast %c2_i32 : i32 to index
    %c0_44 = arith.constant 0 : index
    %c0_45 = arith.constant 0 : index
    %109 = vector.load %arg1[%108, %c0_44, %c0_45] : memref<3x2x32xf32, #tpu.memory_space<vmem>>, vector<1x2x32xf32>
    %110 = vector.shape_cast %109 : vector<1x2x32xf32> to vector<2x32xf32>
    %c0_46 = arith.constant 0 : index
    %c0_47 = arith.constant 0 : index
    %111 = vector.load %arg7[%c0_46, %c0_47] : memref<2x32xf32, #tpu.memory_space<vmem>>, vector<2x32xf32>
    %112 = arith.index_cast %c2_i32 : i32 to index
    %c0_48 = arith.constant 0 : index
    %c0_49 = arith.constant 0 : index
    %113 = vector.load %arg2[%112, %c0_48, %c0_49] : memref<3x32x96xf32, #tpu.memory_space<vmem>>, vector<1x32x96xf32>
    %114 = vector.shape_cast %113 : vector<1x32x96xf32> to vector<32x96xf32>
    %115 = arith.index_cast %c2_i32 : i32 to index
    %c0_50 = arith.constant 0 : index
    %c0_51 = arith.constant 0 : index
    %116 = vector.load %arg3[%115, %c0_50, %c0_51] : memref<3x32x96xf32, #tpu.memory_space<vmem>>, vector<1x32x96xf32>
    %117 = vector.shape_cast %116 : vector<1x32x96xf32> to vector<32x96xf32>
    %118 = arith.index_cast %c2_i32 : i32 to index
    %c0_52 = arith.constant 0 : index
    %c0_53 = arith.constant 0 : index
    %119 = vector.load %arg4[%118, %c0_52, %c0_53] : memref<3x1x96xf32, #tpu.memory_space<vmem>>, vector<1x1x96xf32>
    %120 = vector.shape_cast %119 : vector<1x1x96xf32> to vector<1x96xf32>
    %121 = arith.index_cast %c2_i32 : i32 to index
    %c0_54 = arith.constant 0 : index
    %c0_55 = arith.constant 0 : index
    %122 = vector.load %arg5[%121, %c0_54, %c0_55] : memref<3x1x32xf32, #tpu.memory_space<vmem>>, vector<1x1x32xf32>
    %123 = vector.shape_cast %122 : vector<1x1x32xf32> to vector<1x32xf32>
    %cst_56 = arith.constant dense<0.000000e+00> : vector<2x96xf32>
    %124 = tpu.matmul %111, %114, %cst_56 {dimension_numbers = #tpu.dot_dimension_numbers<[1], [0], [0], [1], [0, 0, 1, 1], [], []>} : vector<2x32xf32>, vector<32x96xf32>, vector<2x96xf32> -> vector<2x96xf32>
    %125 = vector.broadcast %120 : vector<1x96xf32> to vector<2x96xf32>
    %126 = arith.addf %124, %125 : vector<2x96xf32>
    %cst_57 = arith.constant dense<0.000000e+00> : vector<2x96xf32>
    %127 = tpu.matmul %110, %117, %cst_57 {dimension_numbers = #tpu.dot_dimension_numbers<[1], [0], [0], [1], [0, 0, 1, 1], [], []>} : vector<2x32xf32>, vector<32x96xf32>, vector<2x96xf32> -> vector<2x96xf32>
    %128 = vector.extract_strided_slice %126 {offsets = [0, 0], sizes = [2, 32], strides = [1, 1]} : vector<2x96xf32> to vector<2x32xf32>
    %129 = vector.extract_strided_slice %127 {offsets = [0, 0], sizes = [2, 32], strides = [1, 1]} : vector<2x96xf32> to vector<2x32xf32>
    %130 = arith.addf %128, %129 : vector<2x32xf32>
    %131 = arith.negf %130 : vector<2x32xf32>
    %132 = math.exp %131 : vector<2x32xf32>
    %cst_58 = arith.constant 1.000000e+00 : f32
    %133 = vector.broadcast %cst_58 : f32 to vector<2x32xf32>
    %134 = arith.addf %133, %132 : vector<2x32xf32>
    %135 = arith.divf %133, %134 : vector<2x32xf32>
    %136 = vector.extract_strided_slice %126 {offsets = [0, 32], sizes = [2, 32], strides = [1, 1]} : vector<2x96xf32> to vector<2x32xf32>
    %137 = vector.extract_strided_slice %127 {offsets = [0, 32], sizes = [2, 32], strides = [1, 1]} : vector<2x96xf32> to vector<2x32xf32>
    %138 = arith.addf %136, %137 : vector<2x32xf32>
    %139 = arith.negf %138 : vector<2x32xf32>
    %140 = math.exp %139 : vector<2x32xf32>
    %cst_59 = arith.constant 1.000000e+00 : f32
    %141 = vector.broadcast %cst_59 : f32 to vector<2x32xf32>
    %142 = arith.addf %141, %140 : vector<2x32xf32>
    %143 = arith.divf %141, %142 : vector<2x32xf32>
    %144 = vector.extract_strided_slice %126 {offsets = [0, 64], sizes = [2, 32], strides = [1, 1]} : vector<2x96xf32> to vector<2x32xf32>
    %145 = vector.extract_strided_slice %127 {offsets = [0, 64], sizes = [2, 32], strides = [1, 1]} : vector<2x96xf32> to vector<2x32xf32>
    %146 = vector.broadcast %123 : vector<1x32xf32> to vector<2x32xf32>
    %147 = arith.addf %145, %146 : vector<2x32xf32>
    %148 = arith.mulf %135, %147 : vector<2x32xf32>
    %149 = arith.addf %144, %148 : vector<2x32xf32>
    %150 = math.tanh %149 : vector<2x32xf32>
    %cst_60 = arith.constant 1.000000e+00 : f32
    %151 = vector.broadcast %cst_60 : f32 to vector<2x32xf32>
    %152 = arith.subf %151, %143 : vector<2x32xf32>
    %153 = arith.mulf %152, %150 : vector<2x32xf32>
    %154 = arith.mulf %143, %110 : vector<2x32xf32>
    %155 = arith.addf %153, %154 : vector<2x32xf32>
    %156 = arith.index_cast %c2_i32 : i32 to index
    %c0_61 = arith.constant 0 : index
    %c0_62 = arith.constant 0 : index
    %157 = vector.load %arg6[%156, %c0_61, %c0_62] : memref<3x2x32xf32, #tpu.memory_space<vmem>>, vector<1x2x32xf32>
    %158 = vector.shape_cast %157 : vector<1x2x32xf32> to vector<2x32xf32>
    %159 = vector.shape_cast %155 : vector<2x32xf32> to vector<1x2x32xf32>
    tpu.vector_store %arg6[%156, %c0_61, %c0_62], %159 {strides = array<i32>} : memref<3x2x32xf32, #tpu.memory_space<vmem>>, vector<1x2x32xf32>,
    %c0_63 = arith.constant 0 : index
    %c0_64 = arith.constant 0 : index
    %160 = vector.load %arg7[%c0_63, %c0_64] : memref<2x32xf32, #tpu.memory_space<vmem>>, vector<2x32xf32>
    tpu.vector_store %arg7[%c0_63, %c0_64], %155 {strides = array<i32>} : memref<2x32xf32, #tpu.memory_space<vmem>>, vector<2x32xf32>,
    %c3_i32 = arith.constant 3 : i32
    return
  }
}

</mosaic_0001>

<bundles_post_ra>
// kernel: multi_layer_gru_cell_forward.1
= control target key start
LH: loop header
LB: loop body
LE: loop exit
PB: predicated region body
PF: predicated region fallthrough
CT: control target
= control target key end

     0   :  { %11 = vsyncpa [#allocation4], 0  ;;  %s1076_s0 = inlined_call_operand.vmem [shape: f32[2,32], index: 0, kind: input, shape index: {}]   ;;  %s1077_s1 = inlined_call_operand.vmem [shape: f32[3,2,32], index: 1, kind: input, shape index: {}]   ;;  %s1078_s2 = inlined_call_operand.hbm [shape: f32[3,32,96], index: 2, kind: input, shape index: {}]   ;;  %s1079_s3 = inlined_call_operand.hbm [shape: f32[3,32,96], index: 3, kind: input, shape index: {}]   ;;  %s1080_s4 = inlined_call_operand.vmem [shape: f32[3,1,96], index: 4, kind: input, shape index: {}]   ;;  %s1081_s5 = inlined_call_operand.vmem [shape: f32[3,1,32], index: 5, kind: input, shape index: {}]   ;;  %s1082_s6 = inlined_call_operand.hbm [shape: f32[3,2,32], index: 6, kind: output, shape index: {}]  }
   0x1   :  { %12 = vsyncpa [#allocation7], 0 }
   0x2   :  { %13 = vsyncpa [#allocation5], 0  ;;  %s922_s21 = smov [#allocation3]  }
   0x3   :  { %s23_s22 = sshll.u32 %s922_s21, 4  ;;  %s24_s22 = int_to_ptr.vmem [resolvable:$true] %s23_s22 }
   0x4   :  { %s864_s23 = scalar_lea.vmem %s24_s22, 1536  ;;  %p869_p1 = scmp.lt.s32.totalorder %s24_s22, %s24_s22 }
   0x5   :  { %p865_p0 = scmp.ne.s32.totalorder %s24_s22, %s864_s23  ;;  %p870_p2 = scmp.lt.s32.totalorder %s864_s23, %s864_s23 }
   0x7   :  { %p871_p3 = por %p870_p2, %p869_p1 }
   0x9   :  { %p872_p4 = pnand %p871_p3, %p865_p0 }
   0xb   :  { %875 = shalt.err (!%p872_p4)
}
   0xc   :  { %s923_s24 = smov 128   ;;  %s924_s25 = smov 8  }
   0xd   :  { %29 = dma.hbm_to_vmem [thread:$0]  %s1078_s2, 1536, %s24_s22, [#allocation4], %s923_s24, %s923_s24, %s924_s25  }
   0xe   :  { %s925_s28 = smov [#allocation6]  }
   0xf   :  { %s35_s29 = sshll.u32 %s925_s28, 4  ;;  %s36_s29 = int_to_ptr.vmem [resolvable:$true] %s35_s29 }
  0x10   :  { %s884_s30 = scalar_lea.vmem %s36_s29, 1536  ;;  %p889_p6 = scmp.lt.s32.totalorder %s36_s29, %s36_s29 }
  0x11   :  { %p885_p5 = scmp.ne.s32.totalorder %s36_s29, %s884_s30  ;;  %p890_p7 = scmp.lt.s32.totalorder %s884_s30, %s884_s30 }
  0x13   :  { %p891_p8 = por %p890_p7, %p889_p6 }
  0x15   :  { %p892_p9 = pnand %p891_p8, %p885_p5 }
  0x17   :  { %895 = shalt.err (!%p892_p9)
}
  0x18   :  { %41 = dma.hbm_to_vmem [thread:$0]  %s1079_s3, 1536, %s36_s29, [#allocation7], %s923_s24, %s923_s24, %s924_s25  }
  0x19   :  { %916 = dma.done.wait [#allocation4], 1536  }
  0x1a   :  { %917 = vsyncadd [#allocation4], 4294965760 }
  0x1b   :  { %918 = dma.done.wait [#allocation7], 1536  }
  0x1c   :  { %919 = vsyncadd [#allocation7], 4294965760  ;;  %v926_v0 = vmov 0.0   ;;  %vm927_vm0 = vmmov 0   ;;  %v64_v1 = vld [vmem:[#allocation6 + $0x18] sm:$0xff]  ;;  %v63_v3 = vld [vmem:[#allocation6 + $0x10] sm:$0xff] }
  0x1d   :  { %772 = vmatprep.subr.mxu1 %v926_v0  ;;  %761 = vmatprep.subr.mxu0 %v926_v0  ;;  %v60_v2 = vld [vmem:[#allocation3 + $0x18] sm:$0xff]  ;;  %v59_v4 = vld [vmem:[#allocation3 + $0x10] sm:$0xff]  ;;  %vm53_vm1 = vcmask 254976   ;;  %v62_v5 = vld [vmem:[#allocation6 + $0x8] sm:$0xff]  ;;  %vm73_vm2 = vcmask 261120   ;;  %s929_s13 = smov 32  }
  0x1e   :  { %780 = vmatprep.mubr.msk.f32.mxu1 %vm927_vm0, %v926_v0  ;;  %769 = vmatprep.mubr.msk.f32.mxu0 %vm927_vm0, %v926_v0  ;;  %v58_v6 = vld [vmem:[#allocation3 + $0x8] sm:$0xff]  ;;  %v52_v7 = vld [vmem:[%s1076_s0] sm:$0x3]  ;;  %v61_v8 = vld [vmem:[#allocation6] sm:$0xff]  ;;  %s928_s0 = smov 64   ;;  %s930_s18 = smov 96  }
  0x1f   :  { %773 = vmatpush3.msra.mxu1 %v64_v1  ;;  %762 = vmatpush3.msra.mxu0 %v60_v2  ;;  %v57_v9 = vld [vmem:[#allocation3] sm:$0xff]  ;;  %54 = vst.msk [vmem:[#allocation2] sm:$0x3] %vm53_vm1, %v52_v7  ;;  %v55_v10 = vld [vmem:[%s1077_s1] sm:$0x3]  ;;  %v275_v31 = vld [vmem:[#allocation6 + $0x30] sm:$0xff] }
  0x20   :  { %774 = vmatprep.subr.mxu1 %v926_v0  ;;  %763 = vmatprep.subr.mxu0 %v926_v0  ;;  %v714_v11 = vld [vmem:[%s1081_s5] ss:$0 sm:$0xff]  ;;  %v274_v32 = vld [vmem:[#allocation6 + $0x28] sm:$0xff]  ;;  %v273_v33 = vld [vmem:[#allocation6 + $0x20] sm:$0xff] }
  0x21   :  { %775 = vmatpush3.msra.mxu1 %v63_v3  ;;  %764 = vmatpush3.msra.mxu0 %v59_v4  ;;  %v710_v19 = vld [vmem:[%s1080_s4] ss:$0 sm:$0xff]  ;;  %v715_v34 = vld [vmem:[%s1077_s1 + $0x2] sm:$0x3]  ;;  %v270_v37 = vld [vmem:[#allocation3 + $0x30] sm:$0xff] }
  0x22   :  { %776 = vmatprep.subr.mxu1 %v926_v0  ;;  %765 = vmatprep.subr.mxu0 %v926_v0  ;;  %v276_v30 = vld [vmem:[#allocation6 + $0x38] sm:$0xff]  ;;  %v269_v39 = vld [vmem:[#allocation3 + $0x28] sm:$0xff]  ;;  %v268_v40 = vld [vmem:[#allocation3 + $0x20] sm:$0xff] }
  0x23   :  { %777 = vmatpush3.msra.mxu1 %v62_v5  ;;  %766 = vmatpush3.msra.mxu0 %v58_v6  ;;  %v271_v36 = vld [vmem:[#allocation3 + $0x38] sm:$0xff]  ;;  %v489_v4 = vld [vmem:[#allocation6 + $0x50] sm:$0xff]  ;;  %v488_v5 = vld [vmem:[#allocation6 + $0x48] sm:$0xff] }
  0x24   :  { %778 = vmatprep.subr.mxu1 %v926_v0  ;;  %767 = vmatprep.subr.mxu0 %v926_v0  ;;  %v722_v38 = vld [vmem:[%s1081_s5 + $0x1] ss:$0 sm:$0xff]  ;;  %v487_v6 = vld [vmem:[#allocation6 + $0x40] sm:$0xff] }
  0x25   :  { %779 = vmatpush3.msra.mxu1 %v61_v8  ;;  %768 = vmatpush3.msra.mxu0 %v57_v9  ;;  %v718_v53 = vld [vmem:[%s1080_s4 + $0x1] ss:$0 sm:$0xff]  ;;  %v723_v7 = vld [vmem:[%s1077_s1 + $0x4] sm:$0x3] }
  0x26   :  { %781 = vmatmul.mubr.msk.f32.vlgmr.msra.gmra.mxu1 %vm73_vm2, %v55_v10  ;;  %232 = vrot.lane.b32.xlu0 %v714_v11, %s928_s0  ;;  %v56_v12 = vld [vmem:[#allocation2] sm:$0x3]  ;;  %v730_v11 = vld [vmem:[%s1081_s5 + $0x2] ss:$0 sm:$0xff] }
  0x27   :  { %794 = vmatprep.subr.mxu1 %v926_v0  ;;  %802 = vmatprep.mubr.msk.f32.mxu1 %vm927_vm0, %v926_v0  ;;  %v490_v3 = vld [vmem:[#allocation6 + $0x58] sm:$0xff] }
  0x28   :  { %783 = vmatprep.subr.mxu0 %v926_v0  ;;  %770 = vmatmul.mubr.msk.f32.vlgmr.msra.gmra.mxu0 %vm73_vm2, %v56_v12  ;;  %v485_v9 = vld [vmem:[#allocation3 + $0x58] sm:$0xff]  ;;  %v483_v12 = vld [vmem:[#allocation3 + $0x48] sm:$0xff] }
  0x29   :  { %791 = vmatprep.mubr.msk.f32.mxu0 %vm927_vm0, %v926_v0  ;;  %795 = vmatpush3.msra.mxu1 %v276_v30 }
  0x2a   :  { %796 = vmatprep.subr.mxu1 %v926_v0  ;;  %784 = vmatpush3.msra.mxu0 %v271_v36 }
  0x2b   :  { %797 = vmatpush3.msra.mxu1 %v275_v31  ;;  %785 = vmatprep.subr.mxu0 %v926_v0 }
  0x2c   :  { %798 = vmatprep.subr.mxu1 %v926_v0  ;;  %786 = vmatpush3.msra.mxu0 %v270_v37 }
  0x2d   :  { %799 = vmatpush3.msra.mxu1 %v274_v32  ;;  %787 = vmatprep.subr.mxu0 %v926_v0 }
  0x2e   :  { %800 = vmatprep.subr.mxu1 %v926_v0  ;;  %788 = vmatpush3.msra.mxu0 %v269_v39 }
  0x2f   :  { %801 = vmatpush3.msra.mxu1 %v273_v33  ;;  %789 = vmatprep.subr.mxu0 %v926_v0 }
  0x30   :  { %803 = vmatmul.mubr.msk.f32.vlgmr.msra.gmra.mxu1 %vm73_vm2, %v715_v34  ;;  %816 = vmatprep.subr.mxu1 %v926_v0 }
  0x31   :  { %824 = vmatprep.mubr.msk.f32.mxu1 %vm927_vm0, %v926_v0  ;;  %790 = vmatpush3.msra.mxu0 %v268_v40 }
  0x32   :  { %805 = vmatprep.subr.mxu0 %v926_v0  ;;  %817 = vmatpush3.msra.mxu1 %v490_v3 }
  0x33   :  { %818 = vmatprep.subr.mxu1 %v926_v0 }
  0x34   :  { %819 = vmatpush3.msra.mxu1 %v489_v4 }
  0x35   :  { %820 = vmatprep.subr.mxu1 %v926_v0 }
  0x36   :  { %821 = vmatpush3.msra.mxu1 %v488_v5 }
  0x37   :  { %822 = vmatprep.subr.mxu1 %v926_v0 }
  0x38   :  { %823 = vmatpush3.msra.mxu1 %v487_v6 }
  0x39   :  { %825 = vmatmul.mubr.msk.f32.vlgmr.msra.gmra.mxu1 %vm73_vm2, %v723_v7 }
  0x98   :  { %v233_v13 = vpop.permute.xlu0 %232 }
  0xe6   :  { %v216_v14 = vpop.f32.mrf.mxu1 }
  0xe7   :  { %v235_v15 = vadd.f32 %v233_v13, %v216_v14  ;;  %v482_v13 = vld [vmem:[#allocation3 + $0x40] sm:$0xff] }
  0xe8   :  { %v782_v16 = vpop.f32.mrf.mxu1  ;;  %v143_v17 = vpop.f32.mrf.mxu0 }
  0xe9   :  { %237 = vrot.lane.b32.xlu0 %v235_v15, %s928_s0  ;;  %v144_v20 = vadd.f32 %v710_v19, %v143_v17 }
  0xea   :  { %v771_v18 = vpop.f32.mrf.mxu0 }
  0xeb   :  { %v220_v21 = vadd.f32 %v216_v14, %v144_v20 }
  0xed   :  { %253 = vrot.lane.b32.xlu0 %v55_v10, %s929_s13  ;;  %v713_v22 = vmul.f32 -1.442695, %v220_v21  ;;  %v484_v10 = vld [vmem:[#allocation3 + $0x50] sm:$0xff] }
  0xef   :  { %838 = vpow2.f32 %v713_v22 }
  0xf0   :  { %v429_v47 = vpop.f32.mrf.mxu1 }
  0xf1   :  { %445 = vrot.lane.b32.xlu0 %v722_v38, %s928_s0 }
  0xf2   :  { %v804_v48 = vpop.f32.mrf.mxu1 }
  0xfc   :  { %v839_v23 = vpop.eup %838 }
  0xfd   :  { %v224_v24 = vadd.f32 1.0, %v839_v23 }
  0xff   :  { %840 = vrcp.f32 %v224_v24 }
 0x10c   :  { %v841_v25 = vpop.eup %840 }
 0x10d   :  { %v247_v42 = vsub.f32 1.0, %v841_v25 }
 0x15b   :  { %v238_v26 = vpop.permute.xlu0 %237 }
 0x15c   :  { %v240_v27 = vmul.f32 %v841_v25, %v238_v26 }
 0x15e   :  { %242 = vrot.lane.b32.xlu1 %v240_v27, %s928_s0 }
 0x15f   :  { %v254_v41 = vpop.permute.xlu0 %253 }
 0x160   :  { %v256_v44 = vmul.f32 %v841_v25, %v254_v41  ;;  %v726_v25 = vld [vmem:[%s1080_s4 + $0x2] ss:$0 sm:$0xff]  ;;  %s931_s4 = smov [#allocation8]  }
 0x161   :  { %s697_s27 = sshll.u32 %s931_s4, 4  ;;  %s698_s27 = int_to_ptr.vmem [resolvable:$true] %s697_s27 }
 0x162   :  { %s896_s28 = scalar_lea.vmem %s698_s27, 96  ;;  %p901_p11 = scmp.lt.s32.totalorder %s698_s27, %s698_s27 }
 0x163   :  { %v446_v49 = vpop.permute.xlu0 %445  ;;  %p897_p10 = scmp.ne.s32.totalorder %s698_s27, %s896_s28  ;;  %p902_p12 = scmp.lt.s32.totalorder %s896_s28, %s896_s28 }
 0x164   :  { %v448_v50 = vadd.f32 %v446_v49, %v429_v47 }
 0x165   :  { %p903_p13 = por %p902_p12, %p901_p11 }
 0x167   :  { %p904_p0 = pnand %p903_p13, %p897_p10 }
 0x1d0   :  { %v243_v28 = vpop.permute.xlu1 %242 }
 0x1d1   :  { %v245_v29 = vadd.f32 %v243_v28, %v144_v20  ;;  %v643_v20 = vpop.f32.mrf.mxu1 }
 0x1d3   :  { %842 = vtanh.f32 %v245_v29  ;;  %v826_v21 = vpop.f32.mrf.mxu1 }
 0x1e0   :  { %v843_v35 = vpop.eup %842 }
 0x1e1   :  { %249 = vrot.lane.b32.xlu1 %v843_v35, %s930_s18 }
 0x253   :  { %v250_v43 = vpop.permute.xlu1 %249 }
 0x254   :  { %v252_v45 = vmul.f32 %v250_v43, %v247_v42 }
 0x256   :  { %v257_v46 = vadd.f32 %v256_v44, %v252_v45 }
 0x258   :  { %259 = vrot.lane.b32.xlu1 %v257_v46, %s930_s18 }
 0x25c   :  { %450 = vrot.lane.b32.xlu1 %v448_v50, %s928_s0 }
 0x2ca   :  { %v260_v51 = vpop.permute.xlu1 %259 }
 0x2cb   :  { %262 = vst.msk [vmem:[#allocation8] sm:$0x3] %vm53_vm1, %v260_v51  ;;  %263 = vst.msk [vmem:[#allocation2] sm:$0x3] %vm53_vm1, %v260_v51 }
 0x2ce   :  { %v451_v61 = vpop.permute.xlu1 %450 }
 0x2d2   :  { %v266_v52 = vld [vmem:[#allocation2] sm:$0x3] }
 0x2d3   :  { %792 = vmatmul.mubr.msk.f32.vlgmr.msra.gmra.mxu0 %vm73_vm2, %v266_v52 }
 0x2d4   :  { %813 = vmatprep.mubr.msk.f32.mxu0 %vm927_vm0, %v926_v0  ;;  %806 = vmatpush3.msra.mxu0 %v485_v9 }
 0x2d5   :  { %807 = vmatprep.subr.mxu0 %v926_v0 }
 0x2d6   :  { %808 = vmatpush3.msra.mxu0 %v484_v10 }
 0x2d7   :  { %809 = vmatprep.subr.mxu0 %v926_v0 }
 0x2d8   :  { %810 = vmatpush3.msra.mxu0 %v483_v12 }
 0x2d9   :  { %811 = vmatprep.subr.mxu0 %v926_v0 }
 0x2da   :  { %812 = vmatpush3.msra.mxu0 %v482_v13 }
 0x393   :  { %v356_v54 = vpop.f32.mrf.mxu0 }
 0x394   :  { %v357_v55 = vadd.f32 %v718_v53, %v356_v54 }
 0x395   :  { %v793_v56 = vpop.f32.mrf.mxu0 }
 0x396   :  { %v433_v57 = vadd.f32 %v429_v47, %v357_v55 }
 0x398   :  { %v721_v58 = vmul.f32 -1.442695, %v433_v57 }
 0x39a   :  { %844 = vpow2.f32 %v721_v58 }
 0x3a7   :  { %v845_v59 = vpop.eup %844 }
 0x3a8   :  { %v437_v60 = vadd.f32 1.0, %v845_v59 }
 0x3aa   :  { %846 = vrcp.f32 %v437_v60 }
 0x3b7   :  { %v847_v62 = vpop.eup %846 }
 0x3b8   :  { %v453_v63 = vmul.f32 %v847_v62, %v451_v61  ;;  %v460_v15 = vsub.f32 1.0, %v847_v62 }
 0x3ba   :  { %455 = vrot.lane.b32.xlu0 %v453_v63, %s928_s0 }
 0x3be   :  { %466 = vrot.lane.b32.xlu0 %v715_v34, %s929_s13 }
 0x3c2   :  { %659 = vrot.lane.b32.xlu0 %v730_v11, %s928_s0 }
 0x42c   :  { %v456_v1 = vpop.permute.xlu0 %455 }
 0x42d   :  { %v458_v2 = vadd.f32 %v456_v1, %v357_v55 }
 0x42f   :  { %848 = vtanh.f32 %v458_v2 }
 0x430   :  { %v467_v14 = vpop.permute.xlu0 %466 }
 0x431   :  { %v469_v17 = vmul.f32 %v847_v62, %v467_v14 }
 0x434   :  { %v660_v22 = vpop.permute.xlu0 %659 }
 0x435   :  { %v662_v23 = vadd.f32 %v660_v22, %v643_v20 }
 0x43c   :  { %v849_v8 = vpop.eup %848 }
 0x43d   :  { %462 = vrot.lane.b32.xlu1 %v849_v8, %s930_s18 }
 0x4af   :  { %v463_v16 = vpop.permute.xlu1 %462 }
 0x4b0   :  { %v465_v18 = vmul.f32 %v463_v16, %v460_v15 }
 0x4b2   :  { %v470_v19 = vadd.f32 %v469_v17, %v465_v18 }
 0x4b4   :  { %472 = vrot.lane.b32.xlu1 %v470_v19, %s930_s18 }
 0x4b8   :  { %664 = vrot.lane.b32.xlu1 %v662_v23, %s928_s0 }
 0x526   :  { %v473_v24 = vpop.permute.xlu1 %472 }
 0x527   :  { %476 = vst.msk [vmem:[#allocation8 + $0x2] sm:$0x3] %vm53_vm1, %v473_v24  ;;  %477 = vst.msk [vmem:[#allocation2] sm:$0x3] %vm53_vm1, %v473_v24 }
 0x52a   :  { %v665_v33 = vpop.permute.xlu1 %664 }
 0x52e   :  { %v480_v0 = vld [vmem:[#allocation2] sm:$0x3] }
 0x52f   :  { %814 = vmatmul.mubr.msk.f32.vlgmr.msra.gmra.mxu0 %vm73_vm2, %v480_v0 }
 0x5ef   :  { %v570_v26 = vpop.f32.mrf.mxu0 }
 0x5f0   :  { %v571_v27 = vadd.f32 %v726_v25, %v570_v26 }
 0x5f1   :  { %v815_v28 = vpop.f32.mrf.mxu0 }
 0x5f2   :  { %v647_v29 = vadd.f32 %v643_v20, %v571_v27 }
 0x5f4   :  { %v729_v30 = vmul.f32 -1.442695, %v647_v29 }
 0x5f6   :  { %850 = vpow2.f32 %v729_v30 }
 0x603   :  { %v851_v31 = vpop.eup %850 }
 0x604   :  { %v651_v32 = vadd.f32 1.0, %v851_v31 }
 0x606   :  { %852 = vrcp.f32 %v651_v32 }
 0x613   :  { %v853_v34 = vpop.eup %852 }
 0x614   :  { %v667_v35 = vmul.f32 %v853_v34, %v665_v33  ;;  %v674_v40 = vsub.f32 1.0, %v853_v34 }
 0x616   :  { %669 = vrot.lane.b32.xlu0 %v667_v35, %s928_s0 }
 0x61a   :  { %680 = vrot.lane.b32.xlu0 %v723_v7, %s929_s13 }
 0x688   :  { %v670_v36 = vpop.permute.xlu0 %669 }
 0x689   :  { %v672_v37 = vadd.f32 %v670_v36, %v571_v27 }
 0x68b   :  { %854 = vtanh.f32 %v672_v37 }
 0x68c   :  { %v681_v39 = vpop.permute.xlu0 %680 }
 0x68d   :  { %v683_v42 = vmul.f32 %v853_v34, %v681_v39 }
 0x698   :  { %v855_v38 = vpop.eup %854 }
 0x699   :  { %676 = vrot.lane.b32.xlu1 %v855_v38, %s930_s18 }
 0x70b   :  { %v677_v41 = vpop.permute.xlu1 %676 }
 0x70c   :  { %v679_v43 = vmul.f32 %v677_v41, %v674_v40 }
 0x70e   :  { %v684_v44 = vadd.f32 %v683_v42, %v679_v43 }
 0x710   :  { %686 = vrot.lane.b32.xlu1 %v684_v44, %s930_s18 }
 0x782   :  { %v687_v45 = vpop.permute.xlu1 %686 }
 0x783   :  { %690 = vst.msk [vmem:[#allocation8 + $0x4] sm:$0x3] %vm53_vm1, %v687_v45  ;;  %691 = vst.msk [vmem:[#allocation2] sm:$0x3] %vm53_vm1, %v687_v45 }
 0x784   :  { %907 = shalt.err (!%p904_p0)
}
 0x785   :  { %s932_s29 = smov 2  }
 0x786   :  { %703 = dma.vmem_to_hbm [thread:$0]  %s698_s27, 96, %s1082_s6, [#allocation5], %s929_s13, %s929_s13, %s932_s29  }
 0x787   :  { %920 = dma.done.wait [#allocation5], 96  }
 0x788   :  { %921 = vsyncadd [#allocation5], 4294967200 }
 0x789   :  { %707 = vsyncpa [#allocation4], 1 }
 0x78a   :  { %708 = vsyncpa [#allocation7], 1 }
 0x78b   :  { %709 = vsyncpa [#allocation5], 1 }

</bundles_post_ra>
